<compile_context>
chip_gen: v6e
topology: v6e:2x2x1
jax: 0.10.0
libtpu: 0.0.40
codegen_flags: <defaults>
</compile_context>

<pallas_src>
import numpy as np
import jax
import jax.numpy as jnp
from jax.experimental import pallas as pl
from jax.experimental.pallas import tpu as pltpu

ALPHA = 3.0
GAMMA = 5
MARGIN = 0.6
W_POS = 3.0        # nn.BCELoss(weight=[3.0, 1.0])
W_NEG = 1.0
NEG_INF = -1e30    # sentinels: real squared distances stay far below 1e30 (f32-safe)
POS_INF = 1e30


def _triplet_mining_kernel(xr_ref, xc_ref, sqr_ref, sqc_ref, lr_ref, lc_ref,
                           hinge_ref, pos_sc, neg_sc):
    """Grid (row_blocks 'parallel', col_blocks 'arbitrary'). Online hard pos/neg mining."""
    j = pl.program_id(1)

    @pl.when(j == 0)
    def _():
        pos_sc[...] = jnp.full(pos_sc.shape, NEG_INF, dtype=pos_sc.dtype)
        neg_sc[...] = jnp.full(neg_sc.shape, POS_INF, dtype=neg_sc.dtype)

    xr = xr_ref[...]                                 # (TQ, D)
    xc = xc_ref[...]                                 # (TK, D)

    # Single (TQ,TK) gram tile; HIGHEST precision because dist2 = sq_i + sq_j - 2*gram is
    # cancellation-prone and a bf16-pass gram can flip the hard pos/neg argmax.
    gram = jax.lax.dot_general(
        xr, xc, (((1,), (1,)), ((), ())),
        preferred_element_type=jnp.float32,
        precision=jax.lax.Precision.HIGHEST)         # (TQ, TK)

    dist2 = sqr_ref[...] + sqc_ref[...] - 2.0 * gram          # (TQ,1)+(1,TK)-(TQ,TK)
    same = lr_ref[...] == lc_ref[...]                          # (TQ,1) vs (1,TK) -> (TQ,TK)

    # Mine on squared distances; sqrt/clamp deferred to the (TQ,1) finalize below.
    pos_sc[...] = jnp.maximum(
        pos_sc[...],
        jnp.max(jnp.where(same, dist2, NEG_INF), axis=1, keepdims=True))
    neg_sc[...] = jnp.minimum(
        neg_sc[...],
        jnp.min(jnp.where(same, POS_INF, dist2), axis=1, keepdims=True))

    @pl.when(j == pl.num_programs(1) - 1)
    def _():
        d_ap = jnp.sqrt(jnp.maximum(pos_sc[...], 1e-12))       # matches clamp(1e-12).sqrt()
        d_an = jnp.sqrt(jnp.maximum(neg_sc[...], 1e-12))
        hinge_ref[...] = jnp.maximum(d_ap - d_an + MARGIN, 0.0)


def _pick_tile(n, target, quantum):
    """Largest multiple-of-`quantum` divisor of n that is <= target; falls back to n."""
    if n <= target:
        return n
    t = (target // quantum) * quantum
    while t >= quantum:
        if n % t == 0:
            return t
        t -= quantum
    return n   # TODO(synk): pad ragged N instead of falling back to a single full block.


def triplet_hinge_pallas(x, labels, *, tq=256, tk=1024):
    """Per-row hinge relu(d_ap - d_an + margin) of TripletLoss hard mining. Returns (N, 1)."""
    n, d = x.shape
    x = x.astype(jnp.float32)
    labels = labels.astype(jnp.float32)

    tq = _pick_tile(n, tq, 8)      # sublane-quantized row tile
    tk = _pick_tile(n, tk, 128)    # lane-quantized column tile
    ni, nj = n // tq, n // tk

    # Exact f32 squared norms computed once (instead of per-tile gram-diagonal extraction).
    sq = jnp.sum(x * x, axis=1)
    sq_row, sq_col = sq[:, None], sq[None, :]            # (N,1), (1,N)
    lbl_row, lbl_col = labels[:, None], labels[None, :]   # (N,1), (1,N)

    hinge = pl.pallas_call(
        _triplet_mining_kernel,
        out_shape=jax.ShapeDtypeStruct((n, 1), jnp.float32),
        grid_spec=pltpu.PrefetchScalarGridSpec(
            num_scalar_prefetch=0,
            grid=(ni, nj),
            in_specs=[
                pl.BlockSpec((tq, d), lambda i, j: (i, 0)),   # x row block
                pl.BlockSpec((tk, d), lambda i, j: (j, 0)),   # x col block
                pl.BlockSpec((tq, 1), lambda i, j: (i, 0)),   # squared norms (rows)
                pl.BlockSpec((1, tk), lambda i, j: (0, j)),   # squared norms (cols)
                pl.BlockSpec((tq, 1), lambda i, j: (i, 0)),   # labels (rows)
                pl.BlockSpec((1, tk), lambda i, j: (0, j)),   # labels (cols)
            ],
            out_specs=pl.BlockSpec((tq, 1), lambda i, j: (i, 0)),
            scratch_shapes=[pltpu.VMEM((tq, 1), jnp.float32),   # hardest-positive dist^2
                            pltpu.VMEM((tq, 1), jnp.float32)],  # hardest-negative dist^2
        ),
        compiler_params=pltpu.CompilerParams(
            dimension_semantics=("parallel", "arbitrary")),
    )(x, x, sq_row, sq_col, lbl_row, lbl_col)
    return hinge


def remix_loss(inputs, targets):
    """remix_loss forward: Focal_Loss(inputs, targets) + TripletLoss(inputs, targets[:,1])."""
    x = inputs.astype(jnp.float32)
    t = targets.astype(jnp.float32)
    n, d = x.shape

    # ---- Focal_Loss: weighted BCE on sigmoid(x), softplus logits form (plain XLA; O(N*D),
    # memory-bound and lane-sparse at D=2, per perf review kept out of the Pallas kernel). ----
    sp = jnp.maximum(x, 0.0) + jnp.log1p(jnp.exp(-jnp.abs(x)))   # stable softplus(x)
    w = jnp.array([W_POS, W_NEG], dtype=jnp.float32)             # BCELoss weight per column
    ce = jnp.sum(w * (sp - t * x)) / float(n * d)                # BCELoss 'mean' reduction
    pt = jnp.exp(-ce)
    focal = ALPHA * (1.0 - pt) ** GAMMA * ce

    # ---- TripletLoss with hard positive/negative mining (Pallas kernel) ----
    labels = t[:, 1]
    hinge = triplet_hinge_pallas(x, labels)                      # (N, 1)
    trip = jnp.sum(hinge) / float(n)                             # MarginRankingLoss mean

    return focal + trip


def remix_loss_ref(x, t):
    """Pure-JAX reference mirroring the PyTorch forward (sigmoid + clamped-log BCE path)."""
    w = jnp.array([W_POS, W_NEG], dtype=jnp.float32)
    p = jax.nn.sigmoid(x)
    log_p = jnp.maximum(jnp.log(p), -100.0)
    log_1mp = jnp.maximum(jnp.log(1.0 - p), -100.0)
    ce = jnp.mean(w * (-(t * log_p + (1.0 - t) * log_1mp)))
    pt = jnp.exp(-ce)
    focal = ALPHA * (1.0 - pt) ** GAMMA * ce

    sq = jnp.sum(x * x, axis=1, keepdims=True)
    gram = jnp.matmul(x, x.T, precision=jax.lax.Precision.HIGHEST)
    dist = jnp.sqrt(jnp.maximum(sq + sq.T - 2.0 * gram, 1e-12))
    lbl = t[:, 1]
    mask = lbl[:, None] == lbl[None, :]
    d_ap = jnp.max(jnp.where(mask, dist, -jnp.inf), axis=1)
    d_an = jnp.min(jnp.where(mask, jnp.inf, dist), axis=1)
    trip = jnp.mean(jnp.maximum(d_ap - d_an + MARGIN, 0.0))
    return focal + trip


if __name__ == "__main__":
    key = jax.random.PRNGKey(0)
    N, D = 8, 2

    inputs = jax.random.normal(key, (N, D), dtype=jnp.float32)

    # Deterministic binary labels (both classes present so hard-negative mining is valid),
    # one-hot float targets as expected by BCELoss / TripletLoss.
    labels = jnp.array([0, 1, 0, 1, 1, 0, 1, 0], dtype=jnp.int32)
    targets = jax.nn.one_hot(labels, D, dtype=jnp.float32)

    out = jax.block_until_ready(remix_loss(inputs, targets))
    ref = jax.block_until_ready(remix_loss_ref(inputs, targets))

    np.testing.assert_allclose(np.asarray(out), np.asarray(ref), rtol=1e-4, atol=1e-5)
    print("KERNEL_OK")
</pallas_src>

<mosaic_0001>
module attributes {stable_mosaic.version = 11 : i64} {
  func.func @_triplet_mining_kernel(%arg0: i32, %arg1: i32, %arg2: memref<8x2xf32, #tpu.memory_space<vmem>>, %arg3: memref<8x2xf32, #tpu.memory_space<vmem>>, %arg4: memref<8x1xf32, #tpu.memory_space<vmem>>, %arg5: memref<1x8xf32, #tpu.memory_space<vmem>>, %arg6: memref<8x1xf32, #tpu.memory_space<vmem>>, %arg7: memref<1x8xf32, #tpu.memory_space<vmem>>, %arg8: memref<8x1xf32, #tpu.memory_space<vmem>>, %arg9: memref<8x1xf32, #tpu.memory_space<vmem>>, %arg10: memref<8x1xf32, #tpu.memory_space<vmem>>) attributes {dimension_semantics = [#tpu.dimension_semantics<parallel>, #tpu.dimension_semantics<arbitrary>], iteration_bounds = array<i64: 1, 1>, scalar_prefetch = 0 : i64, scratch_operands = 2 : i64, tpu.core_type = #tpu.core_type<tc>, window_params = [{transform_indices = @transform_0, window_bounds = array<i64: 8, 2>}, {transform_indices = @transform_1, window_bounds = array<i64: 8, 2>}, {transform_indices = @transform_2, window_bounds = array<i64: 8, 1>}, {transform_indices = @transform_3, window_bounds = array<i64: 1, 8>}, {transform_indices = @transform_4, window_bounds = array<i64: 8, 1>}, {transform_indices = @transform_5, window_bounds = array<i64: 1, 8>}, {transform_indices = @transform_6, window_bounds = array<i64: 8, 1>}]} {
    %c0_i32 = arith.constant 0 : i32
    %0 = arith.cmpi eq, %arg1, %c0_i32 : i32
    %1 = arith.extui %0 : i1 to i32
    %c0_i32_0 = arith.constant 0 : i32
    %2 = arith.cmpi ne, %1, %c0_i32_0 : i32
    scf.if %2 {
      %cst_27 = arith.constant -1.000000e+30 : f32
      %36 = vector.broadcast %cst_27 : f32 to vector<8x1xf32>
      %c0_28 = arith.constant 0 : index
      %c0_29 = arith.constant 0 : index
      %37 = vector.load %arg9[%c0_28, %c0_29] : memref<8x1xf32, #tpu.memory_space<vmem>>, vector<8x1xf32>
      tpu.vector_store %arg9[%c0_28, %c0_29], %36 {strides = array<i32>} : memref<8x1xf32, #tpu.memory_space<vmem>>, vector<8x1xf32>,
      %cst_30 = arith.constant 1.000000e+30 : f32
      %38 = vector.broadcast %cst_30 : f32 to vector<8x1xf32>
      %c0_31 = arith.constant 0 : index
      %c0_32 = arith.constant 0 : index
      %39 = vector.load %arg10[%c0_31, %c0_32] : memref<8x1xf32, #tpu.memory_space<vmem>>, vector<8x1xf32>
      tpu.vector_store %arg10[%c0_31, %c0_32], %38 {strides = array<i32>} : memref<8x1xf32, #tpu.memory_space<vmem>>, vector<8x1xf32>,
    } else {
    }
    %c0 = arith.constant 0 : index
    %c0_1 = arith.constant 0 : index
    %3 = vector.load %arg2[%c0, %c0_1] : memref<8x2xf32, #tpu.memory_space<vmem>>, vector<8x2xf32>
    %c0_2 = arith.constant 0 : index
    %c0_3 = arith.constant 0 : index
    %4 = vector.load %arg3[%c0_2, %c0_3] : memref<8x2xf32, #tpu.memory_space<vmem>>, vector<8x2xf32>
    %cst = arith.constant dense<0.000000e+00> : vector<8x8xf32>
    %5 = tpu.matmul %3, %4, %cst {dimension_numbers = #tpu.dot_dimension_numbers<[1], [1], [0], [0], [0, 0, 1, 0], [], []>, precision = #tpu.contract_precision<fp32>} : vector<8x2xf32>, vector<8x2xf32>, vector<8x8xf32> -> vector<8x8xf32>
    %c0_4 = arith.constant 0 : index
    %c0_5 = arith.constant 0 : index
    %6 = vector.load %arg4[%c0_4, %c0_5] : memref<8x1xf32, #tpu.memory_space<vmem>>, vector<8x1xf32>
    %c0_6 = arith.constant 0 : index
    %c0_7 = arith.constant 0 : index
    %7 = vector.load %arg5[%c0_6, %c0_7] : memref<1x8xf32, #tpu.memory_space<vmem>>, vector<1x8xf32>
    %8 = vector.broadcast %6 : vector<8x1xf32> to vector<8x8xf32>
    %9 = vector.broadcast %7 : vector<1x8xf32> to vector<8x8xf32>
    %10 = arith.addf %8, %9 : vector<8x8xf32>
    %cst_8 = arith.constant 2.000000e+00 : f32
    %11 = vector.broadcast %cst_8 : f32 to vector<8x8xf32>
    %12 = arith.mulf %11, %5 : vector<8x8xf32>
    %13 = arith.subf %10, %12 : vector<8x8xf32>
    %c0_9 = arith.constant 0 : index
    %c0_10 = arith.constant 0 : index
    %14 = vector.load %arg6[%c0_9, %c0_10] : memref<8x1xf32, #tpu.memory_space<vmem>>, vector<8x1xf32>
    %c0_11 = arith.constant 0 : index
    %c0_12 = arith.constant 0 : index
    %15 = vector.load %arg7[%c0_11, %c0_12] : memref<1x8xf32, #tpu.memory_space<vmem>>, vector<1x8xf32>
    %16 = vector.broadcast %14 : vector<8x1xf32> to vector<8x8xf32>
    %17 = vector.broadcast %15 : vector<1x8xf32> to vector<8x8xf32>
    %18 = arith.cmpf oeq, %16, %17 : vector<8x8xf32>
    %c0_13 = arith.constant 0 : index
    %c0_14 = arith.constant 0 : index
    %19 = vector.load %arg9[%c0_13, %c0_14] : memref<8x1xf32, #tpu.memory_space<vmem>>, vector<8x1xf32>
    %cst_15 = arith.constant -1.000000e+30 : f32
    %20 = vector.broadcast %cst_15 : f32 to vector<8x8xf32>
    %21 = arith.select %18, %13, %20 : vector<8x8xi1>, vector<8x8xf32>
    %cst_16 = arith.constant dense<0xFF800000> : vector<8xf32>
    %22 = vector.multi_reduction <maximumf>, %21, %cst_16 [1] : vector<8x8xf32> to vector<8xf32>
    %23 = vector.shape_cast %22 : vector<8xf32> to vector<8x1xf32>
    %24 = arith.maximumf %19, %23 : vector<8x1xf32>
    %c0_17 = arith.constant 0 : index
    %c0_18 = arith.constant 0 : index
    %25 = vector.load %arg9[%c0_17, %c0_18] : memref<8x1xf32, #tpu.memory_space<vmem>>, vector<8x1xf32>
    tpu.vector_store %arg9[%c0_17, %c0_18], %24 {strides = array<i32>} : memref<8x1xf32, #tpu.memory_space<vmem>>, vector<8x1xf32>,
    %c0_19 = arith.constant 0 : index
    %c0_20 = arith.constant 0 : index
    %26 = vector.load %arg10[%c0_19, %c0_20] : memref<8x1xf32, #tpu.memory_space<vmem>>, vector<8x1xf32>
    %cst_21 = arith.constant 1.000000e+30 : f32
    %27 = vector.broadcast %cst_21 : f32 to vector<8x8xf32>
    %28 = arith.select %18, %27, %13 : vector<8x8xi1>, vector<8x8xf32>
    %cst_22 = arith.constant dense<0x7F800000> : vector<8xf32>
    %29 = vector.multi_reduction <minimumf>, %28, %cst_22 [1] : vector<8x8xf32> to vector<8xf32>
    %30 = vector.shape_cast %29 : vector<8xf32> to vector<8x1xf32>
    %31 = arith.minimumf %26, %30 : vector<8x1xf32>
    %c0_23 = arith.constant 0 : index
    %c0_24 = arith.constant 0 : index
    %32 = vector.load %arg10[%c0_23, %c0_24] : memref<8x1xf32, #tpu.memory_space<vmem>>, vector<8x1xf32>
    tpu.vector_store %arg10[%c0_23, %c0_24], %31 {strides = array<i32>} : memref<8x1xf32, #tpu.memory_space<vmem>>, vector<8x1xf32>,
    %c0_i32_25 = arith.constant 0 : i32
    %33 = arith.cmpi eq, %arg1, %c0_i32_25 : i32
    %34 = arith.extui %33 : i1 to i32
    %c0_i32_26 = arith.constant 0 : i32
    %35 = arith.cmpi ne, %34, %c0_i32_26 : i32
    scf.if %35 {
      %c0_27 = arith.constant 0 : index
      %c0_28 = arith.constant 0 : index
      %36 = vector.load %arg9[%c0_27, %c0_28] : memref<8x1xf32, #tpu.memory_space<vmem>>, vector<8x1xf32>
      %cst_29 = arith.constant 9.99999996E-13 : f32
      %37 = vector.broadcast %cst_29 : f32 to vector<8x1xf32>
      %38 = arith.maximumf %36, %37 : vector<8x1xf32>
      %39 = math.sqrt %38 : vector<8x1xf32>
      %c0_30 = arith.constant 0 : index
      %c0_31 = arith.constant 0 : index
      %40 = vector.load %arg10[%c0_30, %c0_31] : memref<8x1xf32, #tpu.memory_space<vmem>>, vector<8x1xf32>
      %cst_32 = arith.constant 9.99999996E-13 : f32
      %41 = vector.broadcast %cst_32 : f32 to vector<8x1xf32>
      %42 = arith.maximumf %40, %41 : vector<8x1xf32>
      %43 = math.sqrt %42 : vector<8x1xf32>
      %44 = arith.subf %39, %43 : vector<8x1xf32>
      %cst_33 = arith.constant 6.000000e-01 : f32
      %45 = vector.broadcast %cst_33 : f32 to vector<8x1xf32>
      %46 = arith.addf %44, %45 : vector<8x1xf32>
      %cst_34 = arith.constant 0.000000e+00 : f32
      %47 = vector.broadcast %cst_34 : f32 to vector<8x1xf32>
      %48 = arith.maximumf %46, %47 : vector<8x1xf32>
      %c0_35 = arith.constant 0 : index
      %c0_36 = arith.constant 0 : index
      %49 = vector.load %arg8[%c0_35, %c0_36] : memref<8x1xf32, #tpu.memory_space<vmem>>, vector<8x1xf32>
      tpu.vector_store %arg8[%c0_35, %c0_36], %48 {strides = array<i32>} : memref<8x1xf32, #tpu.memory_space<vmem>>, vector<8x1xf32>,
    } else {
    }
    return
  }
  func.func @transform_0(%arg0: i32, %arg1: i32) -> (i32, i32) {
    %c0_i32 = arith.constant 0 : i32
    %c0_i32_0 = arith.constant 0 : i32
    return %arg0, %c0_i32 : i32, i32
  }
  func.func @transform_1(%arg0: i32, %arg1: i32) -> (i32, i32) {
    %c0_i32 = arith.constant 0 : i32
    %c0_i32_0 = arith.constant 0 : i32
    return %arg1, %c0_i32 : i32, i32
  }
  func.func @transform_2(%arg0: i32, %arg1: i32) -> (i32, i32) {
    %c0_i32 = arith.constant 0 : i32
    %c0_i32_0 = arith.constant 0 : i32
    return %arg0, %c0_i32 : i32, i32
  }
  func.func @transform_3(%arg0: i32, %arg1: i32) -> (i32, i32) {
    %c0_i32 = arith.constant 0 : i32
    %c0_i32_0 = arith.constant 0 : i32
    return %c0_i32, %arg1 : i32, i32
  }
  func.func @transform_4(%arg0: i32, %arg1: i32) -> (i32, i32) {
    %c0_i32 = arith.constant 0 : i32
    %c0_i32_0 = arith.constant 0 : i32
    return %arg0, %c0_i32 : i32, i32
  }
  func.func @transform_5(%arg0: i32, %arg1: i32) -> (i32, i32) {
    %c0_i32 = arith.constant 0 : i32
    %c0_i32_0 = arith.constant 0 : i32
    return %c0_i32, %arg1 : i32, i32
  }
  func.func @transform_6(%arg0: i32, %arg1: i32) -> (i32, i32) {
    %c0_i32 = arith.constant 0 : i32
    %c0_i32_0 = arith.constant 0 : i32
    return %arg0, %c0_i32 : i32, i32
  }
}

</mosaic_0001>

<bundles_post_ra>
// kernel: tpu_custom_call.1
= control target key start
LH: loop header
LB: loop body
LE: loop exit
PB: predicated region body
PF: predicated region fallthrough
CT: control target
= control target key end

     0   :  { %vm32_vm0 = vcmask 15360   ;;  %v614_v0 = vmov 0.0   ;;  %vm615_vm1 = vmmov 0   ;;  %v616_v8 = vmov 0   ;;  %s686_s1 = inlined_call_operand.vmem [shape: f32[8,2], index: 1, kind: input, shape index: {}]   ;;  %s687_s0 = inlined_call_operand.vmem [shape: f32[8,2], index: 0, kind: input, shape index: {}]   ;;  %s688_s2 = inlined_call_operand.vmem [shape: f32[8,1], index: 2, kind: input, shape index: {}]   ;;  %s689_s4 = inlined_call_operand.vmem [shape: f32[8,1], index: 4, kind: input, shape index: {}]   ;;  %s690_s3 = inlined_call_operand.vmem [shape: f32[1,8], index: 3, kind: input, shape index: {}]   ;;  %s691_s5 = inlined_call_operand.vmem [shape: f32[1,8], index: 5, kind: input, shape index: {}]   ;;  %s692_s6 = inlined_call_operand.vmem [shape: f32[8,1], index: 6, kind: output, shape index: {}]  }
   0x1   :  { %574 = vmatprep.subr.mxu0 %v614_v0  ;;  %v31_v1 = vld [vmem:[%s686_s1] sm:$0xff]  ;;  %576 = vmatprep.mubr.msk.f32.mxu0 %vm615_vm1, %v614_v0  ;;  %vm27_vm2 = vcmask 7168   ;;  %v617_v18 = vmov -1e+30   ;;  %vm517_vm3 = vcmask 64512  }
   0x2   :  { %v30_v2 = vld [vmem:[%s687_s0] sm:$0xff]  ;;  %v37_v4 = vsel %vm32_vm0, %v31_v1, 0  ;;  %579 = vmatprep.subr.mxu1 %v614_v0  ;;  %581 = vmatprep.mubr.msk.f32.mxu1 %vm615_vm1, %v614_v0  ;;  %28 = vst.msk [vmem:[#allocation2] sm:$0xff] %vm27_vm2, %v617_v18  ;;  %v618_v47 = vmov 1e+30  }
   0x3   :  { %v485_v3 = vld [vmem:[%s688_s2] sm:$0xff]  ;;  %v34_v5 = vsel %vm32_vm0, %v30_v2, 0  ;;  %v70_v6 = vand.u32 4294901760, %v37_v4  ;;  %609 = vset.pattern.permute.xlu0 %v616_v8  ;;  %29 = vst.msk [vmem:[#allocation3] sm:$0xff] %vm27_vm2, %v618_v47 }
   0x4   :  { %v105_v7 = vand.u32 4294901760, %v34_v5  ;;  %489 = vperm.xlu0 %609, %v485_v3   ;;  %v501_v11 = vld [vmem:[%s689_s4] sm:$0xff] }
   0x5   :  { %575 = vmatpush3.xpose.msra.mxu0 %v70_v6  ;;  %v147_v10 = vsub.f32 %v37_v4, %v70_v6  ;;  %v560_v31 = vld [vmem:[%s690_s3] ss:$0 sm:$0xff] }
   0x6   :  { %v106_v9 = vsub.f32 %v34_v5, %v105_v7  ;;  %584 = vmatprep.subr.mxu0 %v614_v0  ;;  %v561_v40 = vld [vmem:[%s691_s5] ss:$0 sm:$0xff] }
   0x7   :  { %v148_v13 = vand.u32 4294901760, %v147_v10 }
   0x8   :  { %v107_v12 = vand.u32 4294901760, %v106_v9  ;;  %505 = vperm.xlu0 %609, %v501_v11  }
   0x9   :  { %v149_v15 = vsub.f32 %v147_v10, %v148_v13  ;;  %v515_v48 = vld [vmem:[#allocation2] sm:$0xff] }
   0xa   :  { %v108_v14 = vsub.f32 %v106_v9, %v107_v12  ;;  %v524_v51 = vld [vmem:[#allocation3] sm:$0xff] }
   0xb   :  { %v150_v17 = vand.u32 4294901760, %v149_v15 }
   0xc   :  { %v109_v16 = vand.u32 4294901760, %v108_v14 }
   0xd   :  { %580 = vmatpush3.xpose.msra.mxu1 %v150_v17 }
   0xe   :  { %577 = vmatmul.mubr.f32.vlgmr.msra.gmra.mxu0 %v109_v16  ;;  %589 = vmatprep.subr.mxu1 %v614_v0 }
   0xf   :  { %585 = vmatpush3.xpose.msra.mxu0 %v147_v10  ;;  %586 = vmatprep.mubr.msk.f32.mxu0 %vm615_vm1, %v614_v0 }
  0x10   :  { %594 = vmatprep.subr.mxu0 %v614_v0  ;;  %582 = vmatmul.mubr.f32.vlgmr.msra.gmra.mxu1 %v105_v7 }
  0x11   :  { %590 = vmatpush3.xpose.msra.mxu1 %v70_v6  ;;  %591 = vmatprep.mubr.msk.f32.mxu1 %vm615_vm1, %v614_v0 }
  0x12   :  { %587 = vmatmul.mubr.f32.vlgmr.msra.gmra.mxu0 %v106_v9  ;;  %599 = vmatprep.subr.mxu1 %v614_v0 }
  0x13   :  { %595 = vmatpush3.xpose.msra.mxu0 %v148_v13  ;;  %596 = vmatprep.mubr.msk.f32.mxu0 %vm615_vm1, %v614_v0 }
  0x14   :  { %592 = vmatmul.mubr.f32.vlgmr.msra.gmra.mxu1 %v107_v12 }
  0x15   :  { %600 = vmatpush3.xpose.msra.mxu1 %v70_v6  ;;  %601 = vmatprep.mubr.msk.f32.mxu1 %vm615_vm1, %v614_v0 }
  0x16   :  { %597 = vmatmul.mubr.f32.vlgmr.msra.gmra.mxu0 %v105_v7 }
  0x18   :  { %602 = vmatmul.mubr.f32.vlgmr.msra.gmra.mxu1 %v105_v7 }
  0x7f   :  { %v490_v30 = vpop.permute.xlu0 %489 }
  0x80   :  { %v498_v36 = vadd.f32 %v560_v31, %v490_v30 }
  0x83   :  { %v506_v41 = vpop.permute.xlu0 %505 }
  0x84   :  { %vm514_vm4 = vcmp.eq.f32.partialorder %v506_v41, %v561_v40 }
  0xce   :  { %v111_v19 = vpop.f32.mrf.mxu0 }
  0xd0   :  { %v578_v20 = vpop.f32.mrf.mxu0  ;;  %v187_v21 = vpop.f32.mrf.mxu1 }
  0xd1   :  { %v188_v22 = vadd.f32 %v187_v21, %v111_v19 }
  0xd2   :  { %v261_v23 = vpop.f32.mrf.mxu0  ;;  %v583_v24 = vpop.f32.mrf.mxu1 }
  0xd3   :  { %v262_v25 = vadd.f32 %v261_v23, %v188_v22 }
  0xd4   :  { %v588_v26 = vpop.f32.mrf.mxu0  ;;  %v335_v27 = vpop.f32.mrf.mxu1 }
  0xd5   :  { %v336_v28 = vadd.f32 %v335_v27, %v262_v25 }
  0xd6   :  { %v409_v29 = vpop.f32.mrf.mxu0  ;;  %v593_v32 = vpop.f32.mrf.mxu1 }
  0xd7   :  { %v410_v33 = vadd.f32 %v409_v29, %v336_v28 }
  0xd8   :  { %v598_v34 = vpop.f32.mrf.mxu0  ;;  %v481_v35 = vpop.f32.mrf.mxu1 }
  0xd9   :  { %v482_v37 = vadd.f32 %v481_v35, %v410_v33 }
  0xda   :  { %v603_v38 = vpop.f32.mrf.mxu1 }
  0xdb   :  { %v499_v39 = vmul.f32 2.0, %v482_v37 }
  0xdd   :  { %v500_v42 = vsub.f32 %v498_v36, %v499_v39 }
  0xdf   :  { %v516_v43 = vsel %vm514_vm4, %v500_v42, -1e+30  ;;  %v525_v45 = vsel %vm514_vm4, 1e+30, %v500_v42 }
  0xe0   :  { %v518_v44 = vsel %vm517_vm3, %v516_v43, -inf  ;;  %v526_v46 = vsel %vm517_vm3, %v525_v45, inf }
  0xe1   :  { %519 = vmax.xlane.f32.xlu1 %v518_v44 }
  0xe5   :  { %527 = vmin.xlane.f32.xlu1 %v526_v46 }
 0x16a   :  { %v520_v49 = vpop.xlane.xlu1 %519 }
 0x16b   :  { %v521_v50 = vmax.f32 %v515_v48, %v520_v49 }
 0x16d   :  { %523 = vst.msk [vmem:[#allocation2] sm:$0xff] %vm27_vm2, %v521_v50 }
 0x16e   :  { %v528_v52 = vpop.xlane.xlu1 %527 }
 0x16f   :  { %v529_v53 = vmin.f32 %v524_v51, %v528_v52 }
 0x171   :  { %530 = vst.msk [vmem:[#allocation3] sm:$0xff] %vm27_vm2, %v529_v53 }
 0x174   :  { %v534_v54 = vld [vmem:[#allocation2] sm:$0xff] }
 0x175   :  { %v535_v55 = vmax.f32 %v534_v54, 1e-12 }
 0x177   :  { %610 = vrsqrt.f32 %v535_v55  ;;  %vm538_vm5 = vcmp.eq.f32.partialorder %v535_v55, inf  ;;  %v541_v63 = vand.u32 2147483648, %v535_v55  ;;  %vm540_vm7 = vcmp.eq.f32.partialorder %v535_v55, 0.0 }
 0x178   :  { %v543_v56 = vld [vmem:[#allocation3] sm:$0xff] }
 0x179   :  { %v544_v57 = vmax.f32 %v543_v56, 1e-12 }
 0x17b   :  { %612 = vrsqrt.f32 %v544_v57  ;;  %vm547_vm6 = vcmp.eq.f32.partialorder %v544_v57, inf  ;;  %v550_v0 = vand.u32 2147483648, %v544_v57  ;;  %vm549_vm8 = vcmp.eq.f32.partialorder %v544_v57, 0.0 }
 0x184   :  { %v611_v58 = vpop.eup %610 }
 0x185   :  { %v537_v59 = vmul.f32 %v611_v58, %v535_v55 }
 0x187   :  { %v539_v61 = vsel %vm538_vm5, %v535_v55, %v537_v59 }
 0x188   :  { %v613_v60 = vpop.eup %612  ;;  %v542_v2 = vsel %vm540_vm7, %v541_v63, %v539_v61 }
 0x189   :  { %v546_v62 = vmul.f32 %v613_v60, %v544_v57 }
 0x18b   :  { %v548_v1 = vsel %vm547_vm6, %v544_v57, %v546_v62 }
 0x18c   :  { %v551_v3 = vsel %vm549_vm8, %v550_v0, %v548_v1 }
 0x18d   :  { %v552_v4 = vsub.f32 %v542_v2, %v551_v3 }
 0x18f   :  { %v553_v5 = vadd.f32 0.6, %v552_v4 }
 0x191   :  { %v554_v6 = vmax.f32 %v553_v5, 0.0 }
 0x193   :  { %555 = vst.msk [vmem:[%s692_s6] sm:$0xff] %vm27_vm2, %v554_v6 }

</bundles_post_ra>
